<compile_context>
chip_gen: v7x
topology: tpu7x:2x2x1
jax: 0.10.0
libtpu: 0.0.40
codegen_flags: <defaults>
</compile_context>

<pallas_src>
import functools

import jax
import jax.numpy as jnp
from jax.experimental import pallas as pl
from jax.experimental.pallas import tpu as pltpu

ALPHA = 0.1  # scales c_in
BETA = 0.5   # scales a @ b


def _round_up(x, m):
    return ((x + m - 1) // m) * m


def _sublane(dtype):
    # Minimum second-minor (sublane) multiple per dtype packing.
    return {4: 8, 2: 16, 1: 32}[jnp.dtype(dtype).itemsize]


def gemm_kernel(a_ref, b_ref, cin_ref, o_ref, acc_ref, *, alpha, beta, k_rem):
    # Grid = (M tiles, N tiles, K tiles); K is the reduction axis (last).
    k = pl.program_id(2)
    nk = pl.num_programs(2)

    @pl.when(k == 0)
    def _():
        acc_ref[...] = jnp.zeros_like(acc_ref)

    a = a_ref[...]
    b = b_ref[...]
    if k_rem is not None:
        # Static-at-trace-time branch, only emitted when K is ragged.  Zero the
        # K-tail of BOTH operands so 0 * garbage (possible NaN/Inf in the
        # out-of-bounds region of the VMEM tile) never reaches the accumulator.
        valid = jnp.where(k == nk - 1, k_rem, a.shape[1])
        a = jnp.where(
            jax.lax.broadcasted_iota(jnp.int32, a.shape, 1) < valid, a, 0
        )
        b = jnp.where(
            jax.lax.broadcasted_iota(jnp.int32, b.shape, 0) < valid, b, 0
        )

    acc_ref[...] += jnp.dot(a, b, preferred_element_type=jnp.float32)

    @pl.when(k == nk - 1)
    def _():
        # Lane-dense store from the f32 accumulator, fused c_in epilogue.
        o_ref[...] = (
            acc_ref[...] * beta + cin_ref[...].astype(jnp.float32) * alpha
        ).astype(o_ref.dtype)


def gemm(a, b, c_in, *, alpha=ALPHA, beta=BETA, tm=512, tn=1024, tk=1024,
         compute_dtype=None):
    """c = (a @ b) * beta + c_in * alpha via a tiled Pallas TPU GEMM.

    Default tiles (512, 1024, 1024) keep the inner K loop MXU-bound at f32 on
    v6e/v7x (~171 flops/byte per step) while fitting v7x's 64 MiB VMEM
    (~20 MiB double-buffered at f32).  Tiles are clamped down (alignment
    preserved) for small problems; ragged shapes need no HBM padding copies.
    `compute_dtype=jnp.bfloat16` casts A/B at the call boundary for 2-4x MXU
    throughput (f32 accumulator / epilogue unchanged).
    """
    M, K = a.shape
    K2, N = b.shape
    assert K == K2 and c_in.shape == (M, N)

    out_dtype = jnp.result_type(a.dtype, b.dtype, c_in.dtype)

    if compute_dtype is not None:
        a = a.astype(compute_dtype)
        b = b.astype(compute_dtype)

    # tm is a second-minor (sublane) dim of the A / c_in / out blocks; the
    # required multiple depends on dtype packing (8 f32, 16 bf16, 32 int8/fp8).
    sub_m = max(_sublane(a.dtype), _sublane(c_in.dtype), _sublane(out_dtype))

    tm_eff = min(tm, _round_up(M, sub_m))
    tn_eff = min(tn, _round_up(N, 128))   # lane dim -> multiple of 128
    tk_eff = min(tk, _round_up(K, 128))   # lane dim of A -> multiple of 128

    # Megacore (v7x has 2 TCs): keep >= 2 tiles on the "parallel" (i, j) grid
    # so both cores get work; harmless one extra step on 1-TC chips.
    if pl.cdiv(M, tm_eff) * pl.cdiv(N, tn_eff) < 2:
        if tn_eff >= 256:
            tn_eff //= 2
        elif tm_eff >= 2 * sub_m:
            tm_eff = _round_up(tm_eff // 2, sub_m)

    grid = (pl.cdiv(M, tm_eff), pl.cdiv(N, tn_eff), pl.cdiv(K, tk_eff))
    k_rem = (K % tk_eff) if (K % tk_eff) != 0 else None

    a_isz = jnp.dtype(a.dtype).itemsize
    b_isz = jnp.dtype(b.dtype).itemsize
    c_isz = jnp.dtype(c_in.dtype).itemsize
    o_isz = jnp.dtype(out_dtype).itemsize

    # VMEM footprint: double-buffered A/B/out, single-buffered c_in, f32 acc.
    needed = (
        2 * tm_eff * tk_eff * a_isz
        + 2 * tk_eff * tn_eff * b_isz
        + 1 * tm_eff * tn_eff * c_isz
        + 2 * tm_eff * tn_eff * o_isz
        + tm_eff * tn_eff * 4
    )
    try:
        vmem_cap = pltpu.get_tpu_info().vmem_capacity_bytes
    except Exception:
        vmem_cap = 64 << 20  # conservative: v7x per-TC VMEM
    headroom = 8 << 20
    vmem_limit = min(max(needed + headroom, 32 << 20), vmem_cap - headroom)
    vmem_limit = max(vmem_limit, needed)  # never under-provision

    # Truthful streamed traffic: A is re-read once per N tile, B once per M tile.
    cost = pl.CostEstimate(
        flops=2 * M * N * K,
        transcendentals=0,
        bytes_accessed=(
            M * K * a_isz * grid[1]
            + K * N * b_isz * grid[0]
            + M * N * c_isz
            + M * N * o_isz
        ),
    )

    kernel = functools.partial(gemm_kernel, alpha=alpha, beta=beta, k_rem=k_rem)

    out = pl.pallas_call(
        kernel,
        out_shape=jax.ShapeDtypeStruct((M, N), out_dtype),
        grid_spec=pltpu.PrefetchScalarGridSpec(
            num_scalar_prefetch=0,
            grid=grid,
            in_specs=[
                pl.BlockSpec((tm_eff, tk_eff), lambda i, j, k: (i, k)),
                pl.BlockSpec((tk_eff, tn_eff), lambda i, j, k: (k, j)),
                # c_in's block index is invariant along K -> single buffer
                # (frees tm*tn*itemsize of VMEM at zero perf cost).
                pl.BlockSpec((tm_eff, tn_eff), lambda i, j, k: (i, j),
                             pipeline_mode=pl.Buffered(1)),
            ],
            out_specs=pl.BlockSpec((tm_eff, tn_eff), lambda i, j, k: (i, j)),
            scratch_shapes=[pltpu.VMEM((tm_eff, tn_eff), jnp.float32)],
        ),
        compiler_params=pltpu.CompilerParams(
            dimension_semantics=("parallel", "parallel", "arbitrary"),
            vmem_limit_bytes=int(vmem_limit),
        ),
        cost_estimate=cost,
    )(a, b, c_in)
    return out


if __name__ == "__main__":
    key = jax.random.PRNGKey(0)
    k1, k2, k3 = jax.random.split(key, 3)

    # Small aligned shapes.
    M, K, N = 64, 128, 256
    a = jax.random.normal(k1, (M, K), dtype=jnp.float32)
    b = jax.random.normal(k2, (K, N), dtype=jnp.float32)
    c_in = jax.random.normal(k3, (M, N), dtype=jnp.float32)

    out = gemm(a, b, c_in)
    jax.block_until_ready(out)
    ref = (a @ b) * BETA + c_in * ALPHA
    assert jnp.allclose(out, ref, atol=1e-4, rtol=1e-4), "mismatch (aligned)"

    # Ragged shapes exercise the no-pad path + in-kernel K-tail masking.
    M2, K2, N2 = 48, 100, 200
    a2 = jax.random.normal(k1, (M2, K2), dtype=jnp.float32)
    b2 = jax.random.normal(k2, (K2, N2), dtype=jnp.float32)
    c2 = jax.random.normal(k3, (M2, N2), dtype=jnp.float32)

    out2 = gemm(a2, b2, c2)
    jax.block_until_ready(out2)
    ref2 = (a2 @ b2) * BETA + c2 * ALPHA
    assert jnp.allclose(out2, ref2, atol=1e-4, rtol=1e-4), "mismatch (ragged)"

    # bf16 fast-path knob (f32 accumulate + epilogue) — loose tolerance.
    out3 = gemm(a, b, c_in, compute_dtype=jnp.bfloat16)
    jax.block_until_ready(out3)
    assert jnp.allclose(out3, ref, atol=0.2, rtol=0.05), "mismatch (bf16)"

    print("KERNEL_OK")
</pallas_src>

<mosaic_0001>
module attributes {stable_mosaic.version = 11 : i64} {
  func.func @gemm_kernel(%arg0: i32, %arg1: i32, %arg2: i32, %arg3: memref<64x128xf32, #tpu.memory_space<vmem>>, %arg4: memref<128x128xf32, #tpu.memory_space<vmem>>, %arg5: memref<64x128xf32, #tpu.memory_space<vmem>>, %arg6: memref<64x128xf32, #tpu.memory_space<vmem>>, %arg7: memref<64x128xf32, #tpu.memory_space<vmem>>) attributes {dimension_semantics = [#tpu.dimension_semantics<parallel>, #tpu.dimension_semantics<parallel>, #tpu.dimension_semantics<arbitrary>], iteration_bounds = array<i64: 1, 2, 1>, scalar_prefetch = 0 : i64, scratch_operands = 1 : i64, tpu.core_type = #tpu.core_type<tc>, window_params = [{transform_indices = @transform_0, window_bounds = array<i64: 64, 128>}, {transform_indices = @transform_1, window_bounds = array<i64: 128, 128>}, {pipeline_mode = #tpu.pipeline_mode<synchronous>, transform_indices = @transform_2, window_bounds = array<i64: 64, 128>}, {transform_indices = @transform_3, window_bounds = array<i64: 64, 128>}]} {
    %c0_i32 = arith.constant 0 : i32
    %0 = arith.cmpi eq, %arg2, %c0_i32 : i32
    %1 = arith.extui %0 : i1 to i32
    %c0_i32_0 = arith.constant 0 : i32
    %2 = arith.cmpi ne, %1, %c0_i32_0 : i32
    scf.if %2 {
      %cst_10 = arith.constant 0.000000e+00 : f32
      %12 = vector.broadcast %cst_10 : f32 to vector<64x128xf32>
      %c0_11 = arith.constant 0 : index
      %c0_12 = arith.constant 0 : index
      %13 = vector.load %arg7[%c0_11, %c0_12] : memref<64x128xf32, #tpu.memory_space<vmem>>, vector<64x128xf32>
      tpu.vector_store %arg7[%c0_11, %c0_12], %12 {strides = array<i32>} : memref<64x128xf32, #tpu.memory_space<vmem>>, vector<64x128xf32>,
    } else {
    }
    %c0 = arith.constant 0 : index
    %c0_1 = arith.constant 0 : index
    %3 = vector.load %arg3[%c0, %c0_1] : memref<64x128xf32, #tpu.memory_space<vmem>>, vector<64x128xf32>
    %c0_2 = arith.constant 0 : index
    %c0_3 = arith.constant 0 : index
    %4 = vector.load %arg4[%c0_2, %c0_3] : memref<128x128xf32, #tpu.memory_space<vmem>>, vector<128x128xf32>
    %c0_4 = arith.constant 0 : index
    %c0_5 = arith.constant 0 : index
    %5 = vector.load %arg7[%c0_4, %c0_5] : memref<64x128xf32, #tpu.memory_space<vmem>>, vector<64x128xf32>
    %cst = arith.constant dense<0.000000e+00> : vector<64x128xf32>
    %6 = tpu.matmul %3, %4, %cst {dimension_numbers = #tpu.dot_dimension_numbers<[1], [0], [0], [1], [0, 0, 1, 1], [], []>} : vector<64x128xf32>, vector<128x128xf32>, vector<64x128xf32> -> vector<64x128xf32>
    %7 = arith.addf %5, %6 : vector<64x128xf32>
    %c0_6 = arith.constant 0 : index
    %c0_7 = arith.constant 0 : index
    %8 = vector.load %arg7[%c0_6, %c0_7] : memref<64x128xf32, #tpu.memory_space<vmem>>, vector<64x128xf32>
    tpu.vector_store %arg7[%c0_6, %c0_7], %7 {strides = array<i32>} : memref<64x128xf32, #tpu.memory_space<vmem>>, vector<64x128xf32>,
    %c0_i32_8 = arith.constant 0 : i32
    %9 = arith.cmpi eq, %arg2, %c0_i32_8 : i32
    %10 = arith.extui %9 : i1 to i32
    %c0_i32_9 = arith.constant 0 : i32
    %11 = arith.cmpi ne, %10, %c0_i32_9 : i32
    scf.if %11 {
      %c0_10 = arith.constant 0 : index
      %c0_11 = arith.constant 0 : index
      %12 = vector.load %arg7[%c0_10, %c0_11] : memref<64x128xf32, #tpu.memory_space<vmem>>, vector<64x128xf32>
      %cst_12 = arith.constant 5.000000e-01 : f32
      %13 = vector.broadcast %cst_12 : f32 to vector<64x128xf32>
      %14 = arith.mulf %12, %13 : vector<64x128xf32>
      %c0_13 = arith.constant 0 : index
      %c0_14 = arith.constant 0 : index
      %15 = vector.load %arg5[%c0_13, %c0_14] : memref<64x128xf32, #tpu.memory_space<vmem>>, vector<64x128xf32>
      %cst_15 = arith.constant 1.000000e-01 : f32
      %16 = vector.broadcast %cst_15 : f32 to vector<64x128xf32>
      %17 = arith.mulf %15, %16 : vector<64x128xf32>
      %18 = arith.addf %14, %17 : vector<64x128xf32>
      %c0_16 = arith.constant 0 : index
      %c0_17 = arith.constant 0 : index
      %19 = vector.load %arg6[%c0_16, %c0_17] : memref<64x128xf32, #tpu.memory_space<vmem>>, vector<64x128xf32>
      tpu.vector_store %arg6[%c0_16, %c0_17], %18 {strides = array<i32>} : memref<64x128xf32, #tpu.memory_space<vmem>>, vector<64x128xf32>,
    } else {
    }
    return
  }
  func.func @transform_0(%arg0: i32, %arg1: i32, %arg2: i32) -> (i32, i32) {
    %c0_i32 = arith.constant 0 : i32
    return %arg0, %arg2 : i32, i32
  }
  func.func @transform_1(%arg0: i32, %arg1: i32, %arg2: i32) -> (i32, i32) {
    %c0_i32 = arith.constant 0 : i32
    return %arg2, %arg1 : i32, i32
  }
  func.func @transform_2(%arg0: i32, %arg1: i32, %arg2: i32) -> (i32, i32) {
    %c0_i32 = arith.constant 0 : i32
    return %arg0, %arg1 : i32, i32
  }
  func.func @transform_3(%arg0: i32, %arg1: i32, %arg2: i32) -> (i32, i32) {
    %c0_i32 = arith.constant 0 : i32
    return %arg0, %arg1 : i32, i32
  }
}

</mosaic_0001>

<bundles_post_ra>
// kernel: tpu_custom_call.1
= control target key start
LH: loop header
LB: loop body
LE: loop exit
PB: predicated region body
PF: predicated region fallthrough
CT: control target
= control target key end

     0   :  { %8 = vsyncpa [#allocation4], 0  ;;  %s1346_s0 = inlined_call_operand.hbm [shape: f32[64,128], index: 0, kind: input, shape index: {}]   ;;  %s1347_s1 = inlined_call_operand.hbm [shape: f32[128,256], index: 1, kind: input, shape index: {}]   ;;  %s1348_s2 = inlined_call_operand.hbm [shape: f32[64,256], index: 2, kind: input, shape index: {}]   ;;  %s1349_s3 = inlined_call_operand.hbm [shape: f32[64,256], index: 3, kind: output, shape index: {}]  }
   0x1   :  { %9 = vsyncpa [#allocation7], 0 }
   0x2   :  { %11 = vsyncpa [#allocation7 + $0x1], 0 }
   0x3   :  { %12 = vsyncpa [#allocation5], 0 }
   0x4   :  { %14 = vsyncpa [#allocation5 + $0x1], 0  ;;  %s1046_s12 = smov 0   ;;  %s1048_s13 = smov 0  }
   0x5   :  { %s1050_s14 = smov 0   ;;  %s1052_s15 = smov 0  }
   0x6   :  { %s1054_s16 = smov 0   ;;  %s1056_s17 = smov 0  }
   0x7 LB: > { %s1077_s18 = sadd.s32 4294967295, %s1014_s17   ;;  %s620_s19 = sadd.s32 4294967294, %s1014_s17   ;;  %s1014_s17 = sphi %s1056_s17, %s20_s17   ;;  %s1010_s16 = sphi %s1054_s16, %s1382_s16   ;;  %s1006_s15 = sphi %s1052_s15, %s1381_s15   ;;  %s1002_s14 = sphi %s1050_s14, %s1380_s14   ;;  %s998_s13 = sphi %s1048_s13, %s1379_s13   ;;  %s994_s12 = sphi %s1046_s12, %s1378_s12  }
   0x8   : > { %p89_p0 = scmp.ne.s32.totalorder %s998_s13, %s994_s12  ;;  %p1351_p1 = scmp.eq.s32.totalorder %s1077_s18, 0 }
   0x9   : > { %p149_p3 = scmp.eq.s32.totalorder %s620_s19, 1  ;;  %p621_p5 = scmp.ge.s32.totalorder %s1014_s17, 1 }
   0xa   : > { %p1086_p4 = por %p1351_p1, %p89_p0  ;;  %p156_p7 = scmp.lt.s32.totalorder %s1014_s17, 3 }
   0xb   : > { %p1091_p6 = por %p149_p3, %p89_p0  ;;  %s1356_s23 = sshll.u32 %s1006_s15, 7 }
   0xc   : > { %s1358_s20 = scalar_select %p1086_p4, 1, 0 }
   0xd   : > { %s1359_s21 = scalar_select %p1091_p6, 1, 0 }
   0xe   : > { %p1096_p8 = pnand %p621_p5, %p156_p7  ;;  %s1108_s26 = scalar_lea.hbm %s1348_s2, %s1356_s23 }
   0xf   : > { %s1016_s27 = smov [#allocation8]   ;;  %s1017_s30 = smov [#allocation3]  }
  0x10   : > { %s1360_s22 = scalar_select %p1096_p8, 1, 0 }
  0x11   : > { %p1350_p9 = pneg %p1096_p8  ;;  %s190_s28 = sshll.u32 %s1016_s27, 4  ;;  %s1110_s28 = int_to_ptr.vmem [resolvable:$true] %s190_s28 }
  0x12   : > { %s1122_s4 = sshll.u32 %s1017_s30, 4  ;;  %s836_s5 = scalar_lea.hbm %s1108_s26, 1024  ;;  %s173_s4 = int_to_ptr.vmem [resolvable:$true] %s1122_s4 }
  0x13   : > { %p1117_p10 = pnand %p1350_p9, %p1086_p4  ;;  %p837_p12 = scmp.ne.s32.totalorder %s1108_s26, %s836_s5 }
  0x14   : > { %s841_s8 = scalar_lea.hbm %s1348_s2, 2048  ;;  %p842_p5 = scmp.lt.u32.totalorder %s1108_s26, %s1348_s2 }
  0x15   : > { %p838_p13 = pneg %p1117_p10  ;;  %p843_p7 = scmp.lt.u32.totalorder %s841_s8, %s836_s5 }
  0x16   : > { %p845_p2 = scmp.lt.u32.totalorder %s836_s5, %s1108_s26 }
  0x17   : > { %p839_p0 = pnand %p838_p13, %p837_p12  ;;  %p844_p11 = por %p843_p7, %p842_p5 }
  0x19   : > { %p840_p3 = pneg %p839_p0  ;;  %p846_p9 = por %p845_p2, %p844_p11 }
  0x1b   : > { %p847_p1 = pnand %p846_p9, %p840_p3 }
  0x1d   : > { %850 = shalt.err (!%p847_p1)
}
  0x1e   : > { %s851_s11 = scalar_lea.vmem %s1110_s28, 1024  ;;  %p859_p4 = scmp.lt.s32.totalorder %s1110_s28, %s1110_s28 }
  0x1f   : > { %p852_p12 = scmp.ne.s32.totalorder %s1110_s28, %s851_s11  ;;  %p860_p8 = scmp.lt.s32.totalorder %s851_s11, %s851_s11 }
  0x21   : > { %p854_p0 = pnand %p852_p12, %p838_p13  ;;  %p861_p5 = por %p860_p8, %p859_p4 }
  0x23   : > { %p855_p6 = pneg %p854_p0 }
  0x25   : > { %p862_p7 = pnand %p861_p5, %p855_p6 }
  0x27   : > { %865 = shalt.err (!%p862_p7)
}
  0x28   : > { %s1357_s19 = smov 256   ;;  %s1019_s24 = smov 128  }
  0x29   : > { %s1020_s25 = smov 8   ;;  %p1362_p1 = scmp.eq.s32.totalorder %s1077_s18, 0 }
  0x2a   : > { %767 = dma.hbm_to_vmem [thread:$0]  (!%p1117_p10), %s1108_s26, 1024, %s1110_s28, [#allocation7], %s1357_s19, %s1019_s24, %s1020_s25  }
  0x2b   : > { %p1363_p2 = scmp.ne.s32.totalorder %s1360_s22, 0  ;;  %s866_s6 = scalar_lea.hbm %s1346_s0, 1024 }
  0x2c   : > { %p867_p8 = scmp.ne.s32.totalorder %s1346_s0, %s866_s6  ;;  %p873_p13 = scmp.lt.u32.totalorder %s866_s6, %s1346_s0 }
  0x2d   : > { %p1364_p4 = pneg %p1363_p2 }
  0x2f   : > { %p1159_p6 = pnand %p1364_p4, %p1362_p1 }
  0x31   : > { %p868_p9 = pneg %p1159_p6 }
  0x33   : > { %p869_p10 = pnand %p868_p9, %p867_p8 }
  0x35   : > { %p870_p11 = pneg %p869_p10 }
  0x37   : > { %p875_p3 = pnand %p873_p13, %p870_p11 }
  0x39   : > { %878 = shalt.err (!%p875_p3)
}
  0x3a   : > { %s879_s29 = scalar_lea.vmem %s173_s4, 1024  ;;  %p887_p7 = scmp.lt.s32.totalorder %s173_s4, %s173_s4 }
  0x3b   : > { %p880_p12 = scmp.ne.s32.totalorder %s173_s4, %s879_s29  ;;  %p888_p1 = scmp.lt.s32.totalorder %s879_s29, %s879_s29 }
  0x3d   : > { %p882_p0 = pnand %p880_p12, %p868_p9  ;;  %p889_p4 = por %p888_p1, %p887_p7 }
  0x3f   : > { %p883_p5 = pneg %p882_p0 }
  0x41   : > { %p890_p2 = pnand %p889_p4, %p883_p5 }
  0x43   : > { %893 = shalt.err (!%p890_p2)
}
  0x44   : > { %764 = dma.hbm_to_vmem [thread:$0]  (!%p1159_p6), %s1346_s0, 1024, %s173_s4, [#allocation4], %s1019_s24, %s1019_s24, %s1020_s25  }
  0x45   : > { %s35_s11 = sadd.s32 1, %s1010_s16  ;;  %s76_s27 = sadd.s32 1, %s1002_s14 }
  0x46   : > { %p37_p2 = scmp.ge.s32.totalorder %s35_s11, 2  ;;  %p83_p8 = scmp.ne.s32.totalorder %s1002_s14, %s998_s13 }
  0x47   : > { %p84_p9 = scmp.eq.s32.totalorder %s1014_s17, 0  ;;  %p1367_p11 = scmp.eq.s32.totalorder %s1077_s18, 1 }
  0x48   : > { %s1384_s11 = smov (%p37_p2, %s35_s11), 0  ;;  %p777_p6 = scmp.lt.s32.totalorder %s1014_s17, 2 }
  0x49   : > { %p1189_p10 = por %p84_p9, %p83_p8  ;;  %p1195_p13 = por %p1367_p11, %p83_p8 }
  0x4a   : > { %s72_s4 = ssub.s32 %s1010_s16, %s1384_s11  ;;  %s204_s6 = sand.u32 1, %s1014_s17  }
  0x4b   : > { %p74_p3 = scmp.eq.s32.totalorder %s72_s4, 0  ;;  %s206_s7 = sand.u32 1, %s1002_s14  }
  0x4c   : > { %s625_s26 = sshll.u32 %s206_s7, 7  ;;  %s626_s28 = sshll.u32 %s1010_s16, 7 }
  0x4d   : > { %s1205_s8 = scalar_select %p74_p3, %s1002_s14, %s76_s27  }
  0x4e   : > { %s1211_s10 = scalar_lea.hbm %s1347_s1, %s626_s28  ;;  %s208_s23 = scalar_lea.vmem [#allocation6], %s625_s26 }
  0x4f   : > { %s217_s19 = sshll.u32 %s208_s23, 4  ;;  %p1215_p12 = pnand %p777_p6, %p1189_p10  ;;  %s1219_s19 = int_to_ptr.vmem [resolvable:$true] %s217_s19 }
  0x50   : > { %s1221_s27 = scalar_lea.sflag [#allocation7], %s204_s6  ;;  %s894_s7 = scalar_lea.hbm %s1211_s10, 2048 }
  0x51   : > { %p895_p0 = scmp.ne.s32.totalorder %s1211_s10, %s894_s7  ;;  %p896_p5 = pneg %p1215_p12 }
  0x52   : > { %s899_s26 = scalar_lea.hbm %s1347_s1, 4096  ;;  %p900_p4 = scmp.lt.u32.totalorder %s1211_s10, %s1347_s1 }
  0x53   : > { %p897_p7 = pnand %p896_p5, %p895_p0  ;;  %p901_p2 = scmp.lt.u32.totalorder %s899_s26, %s894_s7 }
  0x54   : > { %p903_p9 = scmp.lt.u32.totalorder %s894_s7, %s1211_s10 }
  0x55   : > { %p898_p1 = pneg %p897_p7  ;;  %p902_p8 = por %p901_p2, %p900_p4 }
  0x57   : > { %p904_p10 = por %p903_p9, %p902_p8 }
  0x59   : > { %p905_p11 = pnand %p904_p10, %p898_p1 }
  0x5b   : > { %908 = shalt.err (!%p905_p11)
}
  0x5c   : > { %s909_s6 = scalar_lea.vmem %s1219_s19, 2048  ;;  %s1021_s9 = smov [#allocation6]  }
  0x5d   : > { %p910_p6 = scmp.ne.s32.totalorder %s1219_s19, %s909_s6  ;;  %s914_s23 = sshll.u32 %s1021_s9, 4  ;;  %s915_s23 = int_to_ptr.vmem [resolvable:$false] %s914_s23 }
  0x5e   : > { %s916_s30 = scalar_lea.vmem %s915_s23, 4096  ;;  %p917_p7 = scmp.lt.s32.totalorder %s1219_s19, %s915_s23 }
  0x5f   : > { %p912_p3 = pnand %p910_p6, %p896_p5  ;;  %p918_p4 = scmp.lt.s32.totalorder %s916_s30, %s909_s6 }
  0x61   : > { %p913_p0 = pneg %p912_p3  ;;  %p919_p2 = por %p918_p4, %p917_p7 }
  0x63   : > { %p920_p8 = pnand %p919_p2, %p913_p0 }
  0x65   : > { %923 = shalt.err (!%p920_p8)
}
  0x66   : > { %s1370_s7 = smov 256   ;;  %p1371_p5 = scmp.ne.s32.totalorder %s1360_s22, 0 }
  0x67   : > { %771 = dma.hbm_to_vmem [thread:$0]  (!%p1215_p12), %s1211_s10, 2048, %s1219_s19, %s1221_s27, %s1370_s7, %s1019_s24, %s1020_s25  }
  0x68   : > { %229 = sbr.rel (%p1371_p5) target bundleno = 391 (0x187), region = 32  ;;  %p1372_p1 = scmp.eq.s32.totalorder (!%p1371_p5), %s1077_s18, 0 }
  0x6f   : > { %977 = dma.done.wait (%p1372_p1), [#allocation4], 1024   ;;  %p1373_p9 = pmov %p1372_p1 }
  0x70   : > { %s235_s4 = sand.u32 1, %s1077_s18   ;;  %s1260_s26 = sand.u32 1, %s998_s13  }
  0x71   : > { %979 = vsyncadd (%p1373_p9), [#allocation4], 4294966272  ;;  %s629_s28 = sshll.u32 %s1260_s26, 7  ;;  %s236_s29 = scalar_lea.sflag [#allocation7], %s235_s4 }
  0x72   : > { %s1263_s6 = scalar_lea.vmem [#allocation6], %s629_s28  ;;  %p1374_p12 = scmp.ne.s32.totalorder %s1358_s20, 0 }
  0x74   : > { %981 = dma.done.wait (%p1374_p12), %s236_s29, 2048  }
  0x75   : > { %983 = vsyncadd (%p1374_p12), %s236_s29, 4294965248 }
  0x76   : > { %985 = dma.done.wait (%p1374_p12), [#allocation7], 1024  }
  0x77   : > { %987 = vsyncadd (%p1374_p12), [#allocation7], 4294966272  ;;  %v290_v0 = vld [vmem:[%s1263_s6] sm:$0xff]  ;;  %v291_v1 = vld [vmem:[%s1263_s6 + $0x8] sm:$0xff]  ;;  %s630_s18 = sshll.u32 %s1260_s26, 6  ;;  %s1375_s19 = sshll.u32 %s1006_s15, 7 }
  0x78   : > { %v292_v2 = vld [vmem:[%s1263_s6 + $0x10] sm:$0xff]  ;;  %v703_v3 = vpack.c.bf16 %v291_v1, %v290_v0  ;;  %v293_v4 = vld [vmem:[%s1263_s6 + $0x18] sm:$0xff]  ;;  %v294_v6 = vld [vmem:[%s1263_s6 + $0x20] sm:$0xff]  ;;  %s265_s20 = scalar_lea.vmem [#allocation9], %s630_s18  ;;  %s1297_s10 = scalar_lea.hbm %s1349_s3, %s1375_s19 }
  0x79   : > { %v707_v5 = vpack.c.bf16 %v293_v4, %v292_v2  ;;  %v295_v7 = vld [vmem:[%s1263_s6 + $0x28] sm:$0xff]  ;;  %v282_v9 = vld [vmem:[#allocation3] sm:$0xff]  ;;  %v296_v11 = vld [vmem:[%s1263_s6 + $0x30] sm:$0xff]  ;;  %s502_s22 = sshll.u32 %s265_s20, 4  ;;  %s487_s27 = scalar_lea.sflag [#allocation5], %s1260_s26  ;;  %s1290_s22 = int_to_ptr.vmem [resolvable:$true] %s502_s22 }
  0x7a   : > { %704 = vmatprep.subr.bf16.mxu0 %v703_v3  ;;  %735 = vmatprep.subr.bf16.mxu1 %v703_v3  ;;  %v711_v8 = vpack.c.bf16 %v295_v7, %v294_v6  ;;  %v286_v10 = vld [vmem:[#allocation3 + $0x20] sm:$0xff]  ;;  %v297_v12 = vld [vmem:[%s1263_s6 + $0x38] sm:$0xff]  ;;  %v299_v15 = vld [vmem:[%s1263_s6 + $0x48] sm:$0xff]  ;;  %s924_s9 = scalar_lea.vmem %s1290_s22, 1024  ;;  %s1022_s23 = smov [#allocation9]  }
  0x7b   : > { %706 = vmatpush3.bf16.msra.mxu0 %v703_v3  ;;  %743 = vmatpush3.bf16.msra.mxu1 %v703_v3  ;;  %v715_v13 = vpack.c.bf16 %v297_v12, %v296_v11  ;;  %v298_v14 = vld [vmem:[%s1263_s6 + $0x40] sm:$0xff]  ;;  %v300_v17 = vld [vmem:[%s1263_s6 + $0x50] sm:$0xff]  ;;  %v301_v18 = vld [vmem:[%s1263_s6 + $0x58] sm:$0xff]  ;;  %p925_p10 = scmp.ne.s32.totalorder %s1290_s22, %s924_s9  ;;  %s928_s15 = sshll.u32 %s1022_s23, 4  ;;  %s929_s15 = int_to_ptr.vmem [resolvable:$false] %s928_s15 }
  0x7c   : > { %708 = vmatprep.subr.bf16.mxu0 %v707_v5  ;;  %736 = vmatprep.subr.bf16.mxu1 %v707_v5  ;;  %v719_v16 = vpack.c.bf16 %v299_v15, %v298_v14  ;;  %v723_v19 = vpack.c.bf16 %v301_v18, %v300_v17  ;;  %v302_v20 = vld [vmem:[%s1263_s6 + $0x60] sm:$0xff]  ;;  %v303_v21 = vld [vmem:[%s1263_s6 + $0x68] sm:$0xff]  ;;  %v304_v23 = vld [vmem:[%s1263_s6 + $0x70] sm:$0xff]  ;;  %s930_s30 = scalar_lea.vmem %s929_s15, 2048  ;;  %p931_p3 = scmp.lt.s32.totalorder %s1290_s22, %s929_s15 }
  0x7d   : > { %691 = vmatprep.mubr.f32.mxu0 %v282_v9  ;;  %697 = vmatprep.mubr.f32.mxu1 %v286_v10  ;;  %v727_v22 = vpack.c.bf16 %v303_v21, %v302_v20  ;;  %v305_v24 = vld [vmem:[%s1263_s6 + $0x78] sm:$0xff]  ;;  %v283_v26 = vld [vmem:[#allocation3 + $0x8] sm:$0xff]  ;;  %v284_v28 = vld [vmem:[#allocation3 + $0x10] sm:$0xff]  ;;  %p926_p11 = pnand %p925_p10, %p1195_p13  ;;  %p932_p0 = scmp.lt.s32.totalorder %s930_s30, %s924_s9 }
  0x7e   : > { %v731_v25 = vpack.c.bf16 %v305_v24, %v304_v23  ;;  %v287_v27 = vld [vmem:[#allocation3 + $0x28] sm:$0xff]  ;;  %v288_v29 = vld [vmem:[#allocation3 + $0x30] sm:$0xff]  ;;  %v285_v30 = vld [vmem:[#allocation3 + $0x18] sm:$0xff] }
  0x7f   : > { %710 = vmatpush3.bf16.msra.mxu0 %v707_v5  ;;  %744 = vmatpush3.bf16.msra.mxu1 %v707_v5  ;;  %v289_v31 = vld [vmem:[#allocation3 + $0x38] sm:$0xff]  ;;  %v455_v32 = vld [vmem:[#allocation8 + $0x8] sm:$0xff]  ;;  %v454_v34 = vld [vmem:[#allocation8] sm:$0xff]  ;;  %p927_p6 = pneg %p926_p11  ;;  %p933_p7 = por %p932_p0, %p931_p3 }
  0x80   : > { %712 = vmatprep.subr.bf16.mxu0 %v711_v8  ;;  %737 = vmatprep.subr.bf16.mxu1 %v711_v8  ;;  %v459_v33 = vld [vmem:[#allocation8 + $0x28] sm:$0xff]  ;;  %v458_v35 = vld [vmem:[#allocation8 + $0x20] sm:$0xff]  ;;  %v463_v36 = vmul.f32 0.1, %v455_v32  ;;  %v462_v38 = vmul.f32 0.1, %v454_v34 }
  0x81   : > { %v467_v37 = vmul.f32 0.1, %v459_v33  ;;  %v466_v41 = vmul.f32 0.1, %v458_v35  ;;  %v457_v42 = vld [vmem:[#allocation8 + $0x18] sm:$0xff]  ;;  %v456_v48 = vld [vmem:[#allocation8 + $0x10] sm:$0xff]  ;;  %p934_p4 = pnand %p933_p7, %p927_p6 }
  0x82   : > { %v461_v43 = vld [vmem:[#allocation8 + $0x38] sm:$0xff]  ;;  %v460_v49 = vld [vmem:[#allocation8 + $0x30] sm:$0xff]  ;;  %v465_v54 = vmul.f32 0.1, %v457_v42  ;;  %v464_v60 = vmul.f32 0.1, %v456_v48 }
  0x83   : > { %714 = vmatpush3.bf16.msra.mxu0 %v711_v8  ;;  %745 = vmatpush3.bf16.msra.mxu1 %v711_v8  ;;  %v469_v55 = vmul.f32 0.1, %v461_v43  ;;  %v468_v61 = vmul.f32 0.1, %v460_v49 }
  0x84   : > { %716 = vmatprep.subr.bf16.mxu0 %v715_v13  ;;  %738 = vmatprep.subr.bf16.mxu1 %v715_v13 }
  0x87   : > { %718 = vmatpush3.bf16.msra.mxu0 %v715_v13  ;;  %746 = vmatpush3.bf16.msra.mxu1 %v715_v13 }
  0x88   : > { %720 = vmatprep.subr.bf16.mxu0 %v719_v16  ;;  %739 = vmatprep.subr.bf16.mxu1 %v719_v16 }
  0x8b   : > { %722 = vmatpush3.bf16.msra.mxu0 %v719_v16  ;;  %747 = vmatpush3.bf16.msra.mxu1 %v719_v16 }
  0x8c   : > { %724 = vmatprep.subr.bf16.mxu0 %v723_v19  ;;  %740 = vmatprep.subr.bf16.mxu1 %v723_v19 }
  0x8f   : > { %726 = vmatpush3.bf16.msra.mxu0 %v723_v19  ;;  %748 = vmatpush3.bf16.msra.mxu1 %v723_v19 }
  0x90   : > { %728 = vmatprep.subr.bf16.mxu0 %v727_v22  ;;  %741 = vmatprep.subr.bf16.mxu1 %v727_v22 }
  0x93   : > { %730 = vmatpush3.bf16.msra.mxu0 %v727_v22  ;;  %749 = vmatpush3.bf16.msra.mxu1 %v727_v22 }
  0x94   : > { %732 = vmatprep.subr.bf16.mxu0 %v731_v25  ;;  %742 = vmatprep.subr.bf16.mxu1 %v731_v25 }
  0x97   : > { %734 = vmatpush3.bf16.msra.mxu0 %v731_v25  ;;  %750 = vmatpush3.bf16.msra.mxu1 %v731_v25 }
  0x9a   : > { %692 = vmatmul.mubr.f32.vlgmr.msra.gmra.mrb[0].mxu0 %v283_v26  ;;  %698 = vmatmul.mubr.f32.vlgmr.msra.gmra.mrb[0].mxu1 %v287_v27 }
  0x9b   : > { %694 = vmatprep.mubr.f32.mxu0 %v284_v28  ;;  %700 = vmatprep.mubr.f32.mxu1 %v288_v29 }
  0x9e   : > { %695 = vmatmul.mubr.f32.gmra.mrb[2].mxu0 %v285_v30  ;;  %701 = vmatmul.mubr.f32.gmra.mrb[2].mxu1 %v289_v31 }
 0x16d   : > { %v693_v39 = vpop.f32.mrb[0].mxu0  ;;  %v699_v40 = vpop.f32.mrb[0].mxu1 }
 0x16e   : > { %v447_v44 = vmul.f32 0.5, %v693_v39  ;;  %v451_v45 = vmul.f32 0.5, %v699_v40  ;;  %v380_v46 = vpop.f32.mrb[1].mxu0  ;;  %v400_v47 = vpop.f32.mrb[1].mxu1 }
 0x16f   : > { %v446_v50 = vmul.f32 0.5, %v380_v46  ;;  %v450_v51 = vmul.f32 0.5, %v400_v47 }
 0x170   : > { %v471_v52 = vadd.f32 %v463_v36, %v447_v44  ;;  %v475_v53 = vadd.f32 %v467_v37, %v451_v45 }
 0x171   : > { %v470_v56 = vadd.f32 %v462_v38, %v446_v50  ;;  %v474_v57 = vadd.f32 %v466_v41, %v450_v51  ;;  %v696_v58 = vpop.f32.mrb[2].mxu0  ;;  %v702_v59 = vpop.f32.mrb[2].mxu1 }
 0x172   : > { %479 = vst [vmem:[%s265_s20 + $0x8] sm:$0xff] %v471_v52  ;;  %483 = vst [vmem:[%s265_s20 + $0x28] sm:$0xff] %v475_v53  ;;  %v449_v62 = vmul.f32 0.5, %v696_v58  ;;  %v453_v63 = vmul.f32 0.5, %v702_v59  ;;  %v390_v0 = vpop.f32.mrb[3].mxu0  ;;  %v410_v1 = vpop.f32.mrb[3].mxu1 }
 0x173   : > { %478 = vst [vmem:[%s265_s20] sm:$0xff] %v470_v56  ;;  %482 = vst [vmem:[%s265_s20 + $0x20] sm:$0xff] %v474_v57  ;;  %v448_v2 = vmul.f32 0.5, %v390_v0  ;;  %v452_v3 = vmul.f32 0.5, %v410_v1 }
 0x174   : > { %v473_v4 = vadd.f32 %v465_v54, %v449_v62  ;;  %v477_v5 = vadd.f32 %v469_v55, %v453_v63 }
 0x175   : > { %v472_v6 = vadd.f32 %v464_v60, %v448_v2  ;;  %v476_v7 = vadd.f32 %v468_v61, %v452_v3 }
 0x176   : > { %481 = vst [vmem:[%s265_s20 + $0x18] sm:$0xff] %v473_v4  ;;  %485 = vst [vmem:[%s265_s20 + $0x38] sm:$0xff] %v477_v5 }
 0x177   : > { %480 = vst [vmem:[%s265_s20 + $0x10] sm:$0xff] %v472_v6  ;;  %484 = vst [vmem:[%s265_s20 + $0x30] sm:$0xff] %v476_v7 }
 0x178   : > { %937 = shalt.err (!%p934_p4)
}
 0x179   : > { %s938_s7 = scalar_lea.hbm %s1297_s10, 1024  ;;  %s942_s29 = scalar_lea.hbm %s1349_s3, 2048 }
 0x17a   : > { %p939_p2 = scmp.ne.s32.totalorder %s1297_s10, %s938_s7  ;;  %p943_p1 = scmp.lt.u32.totalorder %s1297_s10, %s1349_s3 }
 0x17b   : > { %p944_p9 = scmp.lt.u32.totalorder %s942_s29, %s938_s7  ;;  %p946_p10 = scmp.lt.u32.totalorder %s938_s7, %s1297_s10 }
 0x17c   : > { %p940_p8 = pnand %p939_p2, %p1195_p13 }
 0x17d   : > { %p945_p12 = por %p944_p9, %p943_p1 }
 0x17e   : > { %p941_p5 = pneg %p940_p8 }
 0x17f   : > { %p947_p11 = por %p946_p10, %p945_p12 }
 0x181   : > { %p948_p6 = pnand %p947_p11, %p941_p5 }
 0x183   : > { %951 = shalt.err (!%p948_p6)
}
 0x184   : > { %s1023_s20 = smov 128   ;;  %s1024_s19 = smov 256  }
 0x185   : > { %s1025_s24 = smov 8  }
 0x186   : > { %759 = dma.vmem_to_hbm [thread:$0]  (%p1195_p13), %s1290_s22, 1024, %s1297_s10, %s487_s27, %s1023_s20, %s1024_s19, %s1025_s24  }
 0x187 PF: > { %s517_s25 = sand.u32 1, %s994_s12   ;;  %p1376_p3 = scmp.ne.s32.totalorder %s1359_s21, 0 }
 0x188   : > { %p1377_p0 = scmp.ge.s32.totalorder %s1014_s17, 2  ;;  %s518_s9 = scalar_lea.sflag [#allocation5], %s517_s25 }
 0x18a   : > { %p773_p7 = pnand %p1377_p0, %p1376_p3 }
 0x18c   : > { %989 = dma.done.wait (!%p773_p7), %s518_s9, 1024  }
 0x18d   : > { %991 = vsyncadd (!%p773_p7), %s518_s9, 4294966272  ;;  %s20_s17 = sadd.s32 1, %s1014_s17   ;;  %s1378_s12 = smov %s998_s13 }
 0x18e   : > { %p17_p4 = scmp.ge.s32.totalorder %s20_s17, 4   ;;  %s1379_s13 = smov %s1002_s14 }
 0x18f   : > { %s1380_s14 = smov %s1205_s8  ;;  %s1381_s15 = smov %s1010_s16 }
 0x190   : > { %s1382_s16 = smov %s1384_s11  ;;  %19 = sbr.rel (!%p17_p4) target bundleno = 7 (0x7), region = 96 }
 0x197   :  { %523 = vsyncpa [#allocation4], 1 }
 0x198   :  { %525 = vsyncpa [#allocation4 + $0x1], 1 }
 0x199   :  { %526 = vsyncpa [#allocation7], 1 }
 0x19a   :  { %528 = vsyncpa [#allocation7 + $0x1], 1 }
 0x19b   :  { %529 = vsyncpa [#allocation5], 1 }
 0x19c   :  { %531 = vsyncpa [#allocation5 + $0x1], 1 }

</bundles_post_ra>
